<compile_context>
chip_gen: v6e
topology: v6e:2x2x1
jax: 0.10.0
libtpu: 0.0.40
codegen_flags: <defaults>
</compile_context>

<pallas_src>
import functools

import jax
import jax.numpy as jnp
from jax.experimental import pallas as pl
from jax.experimental.pallas import tpu as pltpu

_LANES = 128
_SUBLANES = 8


def _ln_kernel(x_ref, o_ref, *, min_val):
    # Elementwise hot path: clamp to min_val (VPU) then natural log (EUP).
    x = x_ref[...]
    o_ref[...] = jnp.log(jnp.maximum(x, jnp.asarray(min_val, x.dtype)))


def ln_forward(x, min_val=1e-12, *, tile_rows=2048):
    """y = log(clamp(x, min=min_val)) for arbitrary-shaped float x."""
    orig_shape = x.shape
    orig_dtype = x.dtype

    flat = x.reshape(-1)
    n = flat.shape[0]

    # Pad only up to a multiple of 8*128 = 1024 elements (<= 1023 extra) so the
    # 2-D view has a (sublane, lane)-aligned row count.  Avoids the old
    # pad-to-full-block concatenate (which could nearly double HBM traffic on
    # awkward sizes); for typical NCHW sizes (n % 1024 == 0) no copy is made.
    chunk = _SUBLANES * _LANES
    n_pad = pl.cdiv(n, chunk) * chunk
    if n_pad != n:
        # Pad with min_val so log(pad) stays finite (padding is discarded).
        flat = jnp.concatenate(
            [flat, jnp.full((n_pad - n,), min_val, dtype=orig_dtype)]
        )

    rows = n_pad // _LANES
    # ~1 MiB f32 blocks by default (roofline knee for this mem-bound op);
    # never exceed the actual number of rows.  rows is a multiple of 8, so a
    # clamped tile_rows stays sublane-aligned.
    tile_rows = min(tile_rows, rows)

    x2d = flat.reshape(rows, _LANES)
    # cdiv grid: Pallas handles a ragged last block (OOB writes discarded).
    grid = (pl.cdiv(rows, tile_rows),)

    bytes_per_elem = jnp.dtype(orig_dtype).itemsize
    y2d = pl.pallas_call(
        functools.partial(_ln_kernel, min_val=min_val),
        out_shape=jax.ShapeDtypeStruct((rows, _LANES), orig_dtype),
        grid=grid,
        in_specs=[pl.BlockSpec((tile_rows, _LANES), lambda i: (i, 0))],
        out_specs=pl.BlockSpec((tile_rows, _LANES), lambda i: (i, 0)),
        compiler_params=pltpu.CompilerParams(
            # "parallel" lets the grid shard across TensorCores on multi-TC
            # chips (v7x); harmless no-op on v5e/v6e.
            dimension_semantics=("parallel",),
        ),
        cost_estimate=pl.CostEstimate(
            flops=n_pad,
            transcendentals=n_pad,
            bytes_accessed=2 * n_pad * bytes_per_elem,
        ),
    )(x2d)

    if n_pad == n:
        return y2d.reshape(orig_shape)
    return y2d.reshape(-1)[:n].reshape(orig_shape)


if __name__ == "__main__":
    key = jax.random.PRNGKey(0)
    # Small NCHW-style input consistent with conv-style usage of this module.
    x = jax.random.uniform(
        key, (2, 4, 16, 16), dtype=jnp.float32, minval=-0.5, maxval=2.0
    )

    min_val = 1e-12
    y = ln_forward(x, min_val=min_val)
    jax.block_until_ready(y)

    # Reference check in plain JAX (same semantics as torch.clamp(min)+log).
    y_ref = jnp.log(jnp.maximum(x, jnp.asarray(min_val, x.dtype)))
    assert y.shape == x.shape and y.dtype == x.dtype
    assert jnp.allclose(y, y_ref, rtol=1e-6, atol=1e-6), "mismatch vs reference"

    print("KERNEL_OK")
</pallas_src>

<mosaic_0001>
module attributes {stable_mosaic.version = 11 : i64} {
  func.func @_ln_kernel(%arg0: i32, %arg1: memref<16x128xf32, #tpu.memory_space<vmem>>, %arg2: memref<16x128xf32, #tpu.memory_space<vmem>>) attributes {dimension_semantics = [#tpu.dimension_semantics<parallel>], iteration_bounds = array<i64: 1>, scalar_prefetch = 0 : i64, scratch_operands = 0 : i64, tpu.core_type = #tpu.core_type<tc>, window_params = [{transform_indices = @transform_0, window_bounds = array<i64: 16, 128>}, {transform_indices = @transform_1, window_bounds = array<i64: 16, 128>}]} {
    %c0 = arith.constant 0 : index
    %c0_0 = arith.constant 0 : index
    %0 = vector.load %arg1[%c0, %c0_0] : memref<16x128xf32, #tpu.memory_space<vmem>>, vector<16x128xf32>
    %cst = arith.constant 9.99999996E-13 : f32
    %1 = vector.broadcast %cst : f32 to vector<16x128xf32>
    %2 = arith.maximumf %0, %1 : vector<16x128xf32>
    %3 = math.log %2 : vector<16x128xf32>
    %c0_1 = arith.constant 0 : index
    %c0_2 = arith.constant 0 : index
    %4 = vector.load %arg2[%c0_1, %c0_2] : memref<16x128xf32, #tpu.memory_space<vmem>>, vector<16x128xf32>
    tpu.vector_store %arg2[%c0_1, %c0_2], %3 {strides = array<i32>} : memref<16x128xf32, #tpu.memory_space<vmem>>, vector<16x128xf32>,
    return
  }
  func.func @transform_0(%arg0: i32) -> (i32, i32) {
    %c0_i32 = arith.constant 0 : i32
    %c0_i32_0 = arith.constant 0 : i32
    return %arg0, %c0_i32 : i32, i32
  }
  func.func @transform_1(%arg0: i32) -> (i32, i32) {
    %c0_i32 = arith.constant 0 : i32
    %c0_i32_0 = arith.constant 0 : i32
    return %arg0, %c0_i32 : i32, i32
  }
}

</mosaic_0001>

<bundles_post_ra>
// kernel: tpu_custom_call.1
= control target key start
LH: loop header
LB: loop body
LE: loop exit
PB: predicated region body
PF: predicated region fallthrough
CT: control target
= control target key end

     0   :  { %6 = vsyncpa [#allocation3], 0  ;;  %s128_s0 = inlined_call_operand.hbm [shape: f32[16,128], index: 0, kind: input, shape index: {}]   ;;  %s129_s1 = inlined_call_operand.hbm [shape: f32[16,128], index: 1, kind: output, shape index: {}]  }
   0x1   :  { %7 = vsyncpa [#allocation4], 0  ;;  %s102_s6 = smov [#allocation2]  }
   0x2   :  { %s13_s7 = sshll.u32 %s102_s6, 4  ;;  %s14_s7 = int_to_ptr.vmem [resolvable:$true] %s13_s7 }
   0x3   :  { %s66_s8 = scalar_lea.vmem %s14_s7, 256  ;;  %p71_p1 = scmp.lt.s32.totalorder %s14_s7, %s14_s7 }
   0x4   :  { %p67_p0 = scmp.ne.s32.totalorder %s14_s7, %s66_s8  ;;  %p72_p2 = scmp.lt.s32.totalorder %s66_s8, %s66_s8 }
   0x6   :  { %p73_p3 = por %p72_p2, %p71_p1 }
   0x8   :  { %p74_p4 = pnand %p73_p3, %p67_p0 }
   0xa   :  { %77 = shalt.err (!%p74_p4)
}
   0xb   :  { %s103_s9 = smov 128   ;;  %s104_s10 = smov 8  }
   0xc   :  { %19 = dma.hbm_to_vmem [thread:$0]  %s128_s0, 256, %s14_s7, [#allocation3], %s103_s9, %s103_s9, %s104_s10  }
   0xd   :  { %98 = dma.done.wait [#allocation3], 256  }
   0xe   :  { %99 = vsyncadd [#allocation3], 4294967040  ;;  %v23_v0 = vld [vmem:[#allocation2] sm:$0xff]  ;;  %v24_v1 = vld [vmem:[#allocation2 + $0x8] sm:$0xff]  ;;  %s105_s13 = smov [#allocation5]  }
   0xf   :  { %v25_v2 = vmax.f32 %v23_v0, 1e-12  ;;  %v26_v3 = vmax.f32 %v24_v1, 1e-12  ;;  %s38_s14 = sshll.u32 %s105_s13, 4  ;;  %s39_s14 = int_to_ptr.vmem [resolvable:$true] %s38_s14 }
  0x10   :  { %s78_s15 = scalar_lea.vmem %s39_s14, 256  ;;  %p83_p6 = scmp.lt.s32.totalorder %s39_s14, %s39_s14 }
  0x11   :  { %54 = vlog2.f32 %v25_v2  ;;  %p79_p5 = scmp.ne.s32.totalorder %s39_s14, %s78_s15  ;;  %p84_p7 = scmp.lt.s32.totalorder %s78_s15, %s78_s15 }
  0x12   :  { %56 = vlog2.f32 %v26_v3 }
  0x13   :  { %p85_p8 = por %p84_p7, %p83_p6 }
  0x15   :  { %p86_p9 = pnand %p85_p8, %p79_p5 }
  0x1e   :  { %v55_v4 = vpop.eup %54 }
  0x1f   :  { %v57_v5 = vpop.eup %56  ;;  %v28_v6 = vmul.f32 0.6931472, %v55_v4 }
  0x20   :  { %v30_v7 = vmul.f32 0.6931472, %v57_v5 }
  0x21   :  { %31 = vst [vmem:[#allocation5] sm:$0xff] %v28_v6 }
  0x22   :  { %32 = vst [vmem:[#allocation5 + $0x8] sm:$0xff] %v30_v7 }
  0x23   :  { %89 = shalt.err (!%p86_p9)
}
  0x24   :  { %44 = dma.vmem_to_hbm [thread:$0]  %s39_s14, 256, %s129_s1, [#allocation4], %s103_s9, %s103_s9, %s104_s10  }
  0x25   :  { %100 = dma.done.wait [#allocation4], 256  }
  0x26   :  { %101 = vsyncadd [#allocation4], 4294967040 }
  0x27   :  { %48 = vsyncpa [#allocation3], 1 }
  0x28   :  { %49 = vsyncpa [#allocation4], 1 }

</bundles_post_ra>
